<compile_context>
chip_gen: v5e
topology: v5e:2x2
jax: 0.10.0
libtpu: 0.0.40
codegen_flags: <defaults>
</compile_context>

<pallas_src>
import functools

import jax
import jax.numpy as jnp
from jax import lax
from jax.experimental import pallas as pl
from jax.experimental.pallas import tpu as pltpu

_MIB = 1024 * 1024


def _round_up(v: int, m: int) -> int:
    return -(-v // m) * m


def _vmem_capacity_bytes() -> int:
    try:
        return int(pltpu.get_tpu_info().vmem_capacity_bytes)
    except Exception:
        return 64 * _MIB  # conservative (v7x-sized per-core) fallback


def _laplacian_loss_kernel(x_ref, edge_ref, o_ref, *, C, H, W, N, nb, bpp):
    # x_ref:    (nb, C, L)  slab of images, each image flattened onto the lane axis (L = H*W)
    # edge_ref: (2, L)      f32 column masks: row0 = [col != 0], row1 = [col != W-1]
    # o_ref:    (1, L)      lane-dense per-partial accumulator (revisited across axis 1)
    L = H * W
    b = pl.program_id(1)

    @pl.when(b == 0)
    def _init():
        o_ref[...] = jnp.zeros_like(o_ref)

    # Channel mean (torch.mean(x, dim=1)) -> (nb, L) f32, unrolled over the small static
    # channel count (plain VPU adds; astype is a no-op for f32 inputs).
    x = x_ref[...]
    g = x[:, 0, :].astype(jnp.float32)
    for c in range(1, C):
        g = g + x[:, c, :].astype(jnp.float32)
    g = g * (1.0 / C)

    # 5-point Laplacian with zero padding on the lane-flattened image.
    # pos[p] = p; rolling pos by the same shift as g tells us which source pixel each
    # lane of the rolled copy holds, so the boundary masks are exact regardless of the
    # roll-direction convention.  All masks are tiny (1, L) rows; per stencil term the
    # only full-size work is one multiply and one add.
    pos = lax.broadcasted_iota(jnp.int32, (1, L), 1).astype(jnp.float32)
    lap = -4.0 * g

    # vertical neighbours: shift by +-W along the flat axis
    if H >= 3:
        for s in (W, L - W):
            gq = pltpu.roll(g, s, 1)
            pq = pltpu.roll(pos, s, 1)
            m = jnp.where(jnp.abs(pos - pq) == W, 1.0, 0.0)            # (1, L)
            lap = lap + gq * m
    elif H == 2:
        lap = lap + pltpu.roll(g, W, 1)   # W == L - W: every pixel has one vertical nbr

    # horizontal neighbours: shift by +-1; edge columns removed via the precomputed masks
    if W >= 2 and L > 2:
        edge_l = edge_ref[0:1, :]         # 0.0 where col == 0     (no left neighbour)
        edge_r = edge_ref[1:2, :]         # 0.0 where col == W - 1 (no right neighbour)
        for s in (1, L - 1):
            gq = pltpu.roll(g, s, 1)
            pq = pltpu.roll(pos, s, 1)
            m = (jnp.where(pos - pq == 1, edge_l, 0.0)
                 + jnp.where(pq - pos == 1, edge_r, 0.0))              # (1, L)
            lap = lap + gq * m
    elif W == 2:                           # L == 2 (H == 1): one horizontal neighbour
        lap = lap + pltpu.roll(g, 1, 1)

    a = jnp.abs(lap)                                                    # (nb, L)

    # Accumulate into the lane-dense per-partial row.  Only the final (partial) block and
    # the optional dummy block pay for row masking; the mask is a NaN-safe select because
    # the padded rows of the DMA'd block may hold garbage.
    gb = pl.program_id(0) * bpp + b
    num_valid = jnp.clip(N - gb * nb, 0, nb)

    @pl.when(num_valid == nb)              # hot path: every image row is valid
    def _acc_full():
        o_ref[...] += jnp.sum(a, axis=0, keepdims=True)

    @pl.when(num_valid < nb)               # tail / dummy blocks only
    def _acc_tail():
        row = lax.broadcasted_iota(jnp.int32, a.shape, 0)
        o_ref[...] += jnp.sum(jnp.where(row < num_valid, a, 0.0),
                              axis=0, keepdims=True)


def laplacian_loss(x: jnp.ndarray, *, block_batch=None) -> jnp.ndarray:
    N, C, H, W = x.shape
    L = H * W

    # Free reshape (collapses adjacent dims): the whole image goes onto the lane axis.
    x3 = x.reshape(N, C, L)

    # Tiny column-edge masks for the horizontal stencil terms.  Constant index_map below
    # keeps them VMEM-resident (fetched once, not one DMA stream per step).
    col = jnp.arange(L, dtype=jnp.int32) % W
    edge = jnp.stack([(col != 0), (col != (W - 1))]).astype(jnp.float32)   # (2, L)

    # --- VMEM budget: padded (8,128) tile footprint, real dtype, explicit headroom ---
    itemsize = x.dtype.itemsize
    l_pad = _round_up(L, 128)
    c_pad = _round_up(C, 8)
    cap = _vmem_capacity_bytes()
    vmem_limit = max(cap - 8 * _MIB, 32 * _MIB)           # headroom for Mosaic scratch
    slab_budget = max(vmem_limit - 16 * _MIB, 8 * _MIB)   # headroom for pipeline buffers
    bytes_per_image = (
        2 * c_pad * l_pad * itemsize                               # double-buffered input
        + (6 + (c_pad if itemsize < 4 else 0)) * l_pad * 4)        # f32 stencil temporaries

    if block_batch is None:
        nb = int(slab_budget // bytes_per_image)
        nb = max(1, min(nb, 1024, N))
        if N >= 2:
            nb = min(nb, -(-N // 2))   # >= 2 blocks so both v7x TensorCores get work
        if nb >= 8:
            nb = (nb // 8) * 8         # dense sublanes for the (nb, L) intermediates
    else:
        nb = max(1, min(int(block_batch), N))
    # TODO(synk): add an H-tiled (1-row halo) grid axis for very large images where even
    # nb == 1 exceeds the per-core VMEM budget (v7x 64 MiB) instead of relying on spills.

    num_blocks = -(-N // nb)
    if num_blocks >= 2:
        num_partials = 2
        bpp = -(-num_blocks // 2)      # odd counts get one clamped, zero-weight dummy block
    else:
        num_partials, bpp = 1, num_blocks

    kernel = functools.partial(_laplacian_loss_kernel,
                               C=C, H=H, W=W, N=N, nb=nb, bpp=bpp)

    out = pl.pallas_call(
        kernel,
        out_shape=jax.ShapeDtypeStruct((num_partials, 1, L), jnp.float32),
        grid_spec=pltpu.PrefetchScalarGridSpec(
            num_scalar_prefetch=0,
            grid=(num_partials, bpp),
            in_specs=[
                pl.BlockSpec(
                    (nb, C, L),
                    lambda p, b: (jnp.minimum(p * bpp + b, num_blocks - 1), 0, 0)),
                pl.BlockSpec((2, L), lambda p, b: (0, 0)),
            ],
            out_specs=pl.BlockSpec((None, 1, L), lambda p, b: (p, 0, 0)),
        ),
        compiler_params=pltpu.CompilerParams(
            dimension_semantics=("parallel", "arbitrary"),
            vmem_limit_bytes=int(vmem_limit)),
        cost_estimate=pl.CostEstimate(
            flops=int(N * L * (C + 12)),
            transcendentals=0,
            bytes_accessed=int(N * C * L * itemsize + edge.size * 4
                               + num_partials * L * 4)),
    )(x3, edge)

    return jnp.sum(out) / float(N * L)


def laplacian_loss_ref(x: jnp.ndarray) -> jnp.ndarray:
    """Pure-JAX reference: padded 3x3 Laplacian stencil (matches F.conv2d)."""
    g = jnp.mean(x.astype(jnp.float32), axis=1)               # (N, H, W)
    gp = jnp.pad(g, ((0, 0), (1, 1), (1, 1)))
    lap = (gp[:, :-2, 1:-1] + gp[:, 2:, 1:-1]
           + gp[:, 1:-1, :-2] + gp[:, 1:-1, 2:]
           - 4.0 * gp[:, 1:-1, 1:-1])
    return jnp.mean(jnp.abs(lap))


if __name__ == "__main__":
    x = jax.random.normal(jax.random.PRNGKey(0), (2, 4, 16, 16), dtype=jnp.float32)
    loss = jax.block_until_ready(laplacian_loss(x))
    ref = laplacian_loss_ref(x)
    assert loss.shape == (), loss.shape
    assert jnp.allclose(loss, ref, rtol=1e-5, atol=1e-6), (loss, ref)

    # Multi-block auto path: partial tail block, two "parallel" partials, C=3, W=24.
    x2 = jax.random.normal(jax.random.PRNGKey(1), (7, 3, 16, 24), dtype=jnp.float32)
    loss2 = jax.block_until_ready(laplacian_loss(x2))
    ref2 = laplacian_loss_ref(x2)
    assert jnp.allclose(loss2, ref2, rtol=1e-5, atol=1e-6), (loss2, ref2)

    # Odd block count: exercises the clamped zero-weight dummy block and the tail mask.
    loss3 = jax.block_until_ready(laplacian_loss(x2, block_batch=3))
    assert jnp.allclose(loss3, ref2, rtol=1e-5, atol=1e-6), (loss3, ref2)

    print("KERNEL_OK")
</pallas_src>

<mosaic_0001>
module attributes {stable_mosaic.version = 11 : i64} {
  func.func @_laplacian_loss_kernel(%arg0: i32, %arg1: i32, %arg2: memref<1x4x256xf32, #tpu.memory_space<vmem>>, %arg3: memref<2x256xf32, #tpu.memory_space<vmem>>, %arg4: memref<1x1x256xf32, #tpu.memory_space<vmem>>) attributes {dimension_semantics = [#tpu.dimension_semantics<parallel>, #tpu.dimension_semantics<arbitrary>], iteration_bounds = array<i64: 2, 1>, scalar_prefetch = 0 : i64, scratch_operands = 0 : i64, tpu.core_type = #tpu.core_type<tc>, window_params = [{transform_indices = @transform_0, window_bounds = array<i64: 1, 4, 256>}, {pipeline_mode = #tpu.pipeline_mode<synchronous>, transform_indices = @transform_1, window_bounds = array<i64: 2, 256>}, {transform_indices = @transform_2, window_bounds = array<i64: 1, 1, 256>}]} {
    %c0_i32 = arith.constant 0 : i32
    %0 = arith.cmpi eq, %arg1, %c0_i32 : i32
    %1 = arith.extui %0 : i1 to i32
    %c0_i32_0 = arith.constant 0 : i32
    %2 = arith.cmpi ne, %1, %c0_i32_0 : i32
    scf.if %2 {
      %cst_33 = arith.constant 0.000000e+00 : f32
      %88 = vector.broadcast %cst_33 : f32 to vector<1x256xf32>
      %c0_34 = arith.constant 0 : index
      %c0_35 = arith.constant 0 : index
      %c0_36 = arith.constant 0 : index
      %89 = vector.load %arg4[%c0_34, %c0_35, %c0_36] : memref<1x1x256xf32, #tpu.memory_space<vmem>>, vector<1x1x256xf32>
      %90 = vector.shape_cast %89 : vector<1x1x256xf32> to vector<1x256xf32>
      %91 = vector.shape_cast %88 : vector<1x256xf32> to vector<1x1x256xf32>
      tpu.vector_store %arg4[%c0_34, %c0_35, %c0_36], %91 {strides = array<i32>} : memref<1x1x256xf32, #tpu.memory_space<vmem>>, vector<1x1x256xf32>,
    } else {
    }
    %c0 = arith.constant 0 : index
    %c0_1 = arith.constant 0 : index
    %c0_2 = arith.constant 0 : index
    %3 = vector.load %arg2[%c0, %c0_1, %c0_2] : memref<1x4x256xf32, #tpu.memory_space<vmem>>, vector<1x4x256xf32>
    %4 = vector.extract_strided_slice %3 {offsets = [0, 0, 0], sizes = [1, 1, 256], strides = [1, 1, 1]} : vector<1x4x256xf32> to vector<1x1x256xf32>
    %5 = vector.shape_cast %4 : vector<1x1x256xf32> to vector<1x256xf32>
    %6 = vector.extract_strided_slice %3 {offsets = [0, 1, 0], sizes = [1, 1, 256], strides = [1, 1, 1]} : vector<1x4x256xf32> to vector<1x1x256xf32>
    %7 = vector.shape_cast %6 : vector<1x1x256xf32> to vector<1x256xf32>
    %8 = arith.addf %5, %7 : vector<1x256xf32>
    %9 = vector.extract_strided_slice %3 {offsets = [0, 2, 0], sizes = [1, 1, 256], strides = [1, 1, 1]} : vector<1x4x256xf32> to vector<1x1x256xf32>
    %10 = vector.shape_cast %9 : vector<1x1x256xf32> to vector<1x256xf32>
    %11 = arith.addf %8, %10 : vector<1x256xf32>
    %12 = vector.extract_strided_slice %3 {offsets = [0, 3, 0], sizes = [1, 1, 256], strides = [1, 1, 1]} : vector<1x4x256xf32> to vector<1x1x256xf32>
    %13 = vector.shape_cast %12 : vector<1x1x256xf32> to vector<1x256xf32>
    %14 = arith.addf %11, %13 : vector<1x256xf32>
    %cst = arith.constant 2.500000e-01 : f32
    %15 = vector.broadcast %cst : f32 to vector<1x256xf32>
    %16 = arith.mulf %14, %15 : vector<1x256xf32>
    %17 = tpu.iota {dimensions = array<i32: 1>} : vector<1x256xi32>
    %18 = arith.sitofp %17 : vector<1x256xi32> to vector<1x256xf32>
    %cst_3 = arith.constant -4.000000e+00 : f32
    %19 = vector.broadcast %cst_3 : f32 to vector<1x256xf32>
    %20 = arith.mulf %19, %16 : vector<1x256xf32>
    %c16_i32 = arith.constant 16 : i32
    %21 = tpu.dynamic_rotate %16 by %c16_i32 dim 1 : vector<1x256xf32>, i32 -> vector<1x256xf32>
    %c16_i32_4 = arith.constant 16 : i32
    %22 = tpu.dynamic_rotate %18 by %c16_i32_4 dim 1 : vector<1x256xf32>, i32 -> vector<1x256xf32>
    %23 = arith.subf %18, %22 : vector<1x256xf32>
    %24 = math.absf %23 : vector<1x256xf32>
    %cst_5 = arith.constant 1.600000e+01 : f32
    %25 = vector.broadcast %cst_5 : f32 to vector<1x256xf32>
    %26 = arith.cmpf oeq, %24, %25 : vector<1x256xf32>
    %cst_6 = arith.constant 1.000000e+00 : f32
    %cst_7 = arith.constant 0.000000e+00 : f32
    %27 = vector.broadcast %cst_6 : f32 to vector<1x256xf32>
    %28 = vector.broadcast %cst_7 : f32 to vector<1x256xf32>
    %29 = arith.select %26, %27, %28 : vector<1x256xi1>, vector<1x256xf32>
    %30 = arith.mulf %21, %29 : vector<1x256xf32>
    %31 = arith.addf %20, %30 : vector<1x256xf32>
    %c240_i32 = arith.constant 240 : i32
    %32 = tpu.dynamic_rotate %16 by %c240_i32 dim 1 : vector<1x256xf32>, i32 -> vector<1x256xf32>
    %c240_i32_8 = arith.constant 240 : i32
    %33 = tpu.dynamic_rotate %18 by %c240_i32_8 dim 1 : vector<1x256xf32>, i32 -> vector<1x256xf32>
    %34 = arith.subf %18, %33 : vector<1x256xf32>
    %35 = math.absf %34 : vector<1x256xf32>
    %cst_9 = arith.constant 1.600000e+01 : f32
    %36 = vector.broadcast %cst_9 : f32 to vector<1x256xf32>
    %37 = arith.cmpf oeq, %35, %36 : vector<1x256xf32>
    %cst_10 = arith.constant 1.000000e+00 : f32
    %cst_11 = arith.constant 0.000000e+00 : f32
    %38 = vector.broadcast %cst_10 : f32 to vector<1x256xf32>
    %39 = vector.broadcast %cst_11 : f32 to vector<1x256xf32>
    %40 = arith.select %37, %38, %39 : vector<1x256xi1>, vector<1x256xf32>
    %41 = arith.mulf %32, %40 : vector<1x256xf32>
    %42 = arith.addf %31, %41 : vector<1x256xf32>
    %c0_12 = arith.constant 0 : index
    %c0_13 = arith.constant 0 : index
    %43 = vector.load %arg3[%c0_12, %c0_13] : memref<2x256xf32, #tpu.memory_space<vmem>>, vector<1x256xf32>
    %c1 = arith.constant 1 : index
    %c0_14 = arith.constant 0 : index
    %44 = vector.load %arg3[%c1, %c0_14] : memref<2x256xf32, #tpu.memory_space<vmem>>, vector<1x256xf32>
    %c1_i32 = arith.constant 1 : i32
    %45 = tpu.dynamic_rotate %16 by %c1_i32 dim 1 : vector<1x256xf32>, i32 -> vector<1x256xf32>
    %c1_i32_15 = arith.constant 1 : i32
    %46 = tpu.dynamic_rotate %18 by %c1_i32_15 dim 1 : vector<1x256xf32>, i32 -> vector<1x256xf32>
    %47 = arith.subf %18, %46 : vector<1x256xf32>
    %cst_16 = arith.constant 1.000000e+00 : f32
    %48 = vector.broadcast %cst_16 : f32 to vector<1x256xf32>
    %49 = arith.cmpf oeq, %47, %48 : vector<1x256xf32>
    %cst_17 = arith.constant 0.000000e+00 : f32
    %50 = vector.broadcast %cst_17 : f32 to vector<1x256xf32>
    %51 = arith.select %49, %43, %50 : vector<1x256xi1>, vector<1x256xf32>
    %52 = arith.subf %46, %18 : vector<1x256xf32>
    %cst_18 = arith.constant 1.000000e+00 : f32
    %53 = vector.broadcast %cst_18 : f32 to vector<1x256xf32>
    %54 = arith.cmpf oeq, %52, %53 : vector<1x256xf32>
    %cst_19 = arith.constant 0.000000e+00 : f32
    %55 = vector.broadcast %cst_19 : f32 to vector<1x256xf32>
    %56 = arith.select %54, %44, %55 : vector<1x256xi1>, vector<1x256xf32>
    %57 = arith.addf %51, %56 : vector<1x256xf32>
    %58 = arith.mulf %45, %57 : vector<1x256xf32>
    %59 = arith.addf %42, %58 : vector<1x256xf32>
    %c255_i32 = arith.constant 255 : i32
    %60 = tpu.dynamic_rotate %16 by %c255_i32 dim 1 : vector<1x256xf32>, i32 -> vector<1x256xf32>
    %c255_i32_20 = arith.constant 255 : i32
    %61 = tpu.dynamic_rotate %18 by %c255_i32_20 dim 1 : vector<1x256xf32>, i32 -> vector<1x256xf32>
    %62 = arith.subf %18, %61 : vector<1x256xf32>
    %cst_21 = arith.constant 1.000000e+00 : f32
    %63 = vector.broadcast %cst_21 : f32 to vector<1x256xf32>
    %64 = arith.cmpf oeq, %62, %63 : vector<1x256xf32>
    %cst_22 = arith.constant 0.000000e+00 : f32
    %65 = vector.broadcast %cst_22 : f32 to vector<1x256xf32>
    %66 = arith.select %64, %43, %65 : vector<1x256xi1>, vector<1x256xf32>
    %67 = arith.subf %61, %18 : vector<1x256xf32>
    %cst_23 = arith.constant 1.000000e+00 : f32
    %68 = vector.broadcast %cst_23 : f32 to vector<1x256xf32>
    %69 = arith.cmpf oeq, %67, %68 : vector<1x256xf32>
    %cst_24 = arith.constant 0.000000e+00 : f32
    %70 = vector.broadcast %cst_24 : f32 to vector<1x256xf32>
    %71 = arith.select %69, %44, %70 : vector<1x256xi1>, vector<1x256xf32>
    %72 = arith.addf %66, %71 : vector<1x256xf32>
    %73 = arith.mulf %60, %72 : vector<1x256xf32>
    %74 = arith.addf %59, %73 : vector<1x256xf32>
    %75 = math.absf %74 : vector<1x256xf32>
    %c1_i32_25 = arith.constant 1 : i32
    %76 = arith.muli %arg0, %c1_i32_25 : i32
    %77 = arith.addi %76, %arg1 : i32
    %c1_i32_26 = arith.constant 1 : i32
    %78 = arith.muli %77, %c1_i32_26 : i32
    %c2_i32 = arith.constant 2 : i32
    %79 = arith.subi %c2_i32, %78 : i32
    %c0_i32_27 = arith.constant 0 : i32
    %c1_i32_28 = arith.constant 1 : i32
    %80 = arith.maxsi %c0_i32_27, %79 : i32
    %81 = arith.minsi %c1_i32_28, %80 : i32
    %c1_i32_29 = arith.constant 1 : i32
    %82 = arith.cmpi eq, %81, %c1_i32_29 : i32
    %83 = arith.extui %82 : i1 to i32
    %c0_i32_30 = arith.constant 0 : i32
    %84 = arith.cmpi ne, %83, %c0_i32_30 : i32
    scf.if %84 {
      %c0_33 = arith.constant 0 : index
      %c0_34 = arith.constant 0 : index
      %c0_35 = arith.constant 0 : index
      %88 = vector.load %arg4[%c0_33, %c0_34, %c0_35] : memref<1x1x256xf32, #tpu.memory_space<vmem>>, vector<1x1x256xf32>
      %89 = vector.shape_cast %88 : vector<1x1x256xf32> to vector<1x256xf32>
      %cst_36 = arith.constant dense<0.000000e+00> : vector<256xf32>
      %90 = vector.multi_reduction <add>, %75, %cst_36 [0] : vector<1x256xf32> to vector<256xf32>
      %91 = vector.shape_cast %90 : vector<256xf32> to vector<1x256xf32>
      %92 = arith.addf %89, %91 : vector<1x256xf32>
      %c0_37 = arith.constant 0 : index
      %c0_38 = arith.constant 0 : index
      %c0_39 = arith.constant 0 : index
      %93 = vector.load %arg4[%c0_37, %c0_38, %c0_39] : memref<1x1x256xf32, #tpu.memory_space<vmem>>, vector<1x1x256xf32>
      %94 = vector.shape_cast %93 : vector<1x1x256xf32> to vector<1x256xf32>
      %95 = vector.shape_cast %92 : vector<1x256xf32> to vector<1x1x256xf32>
      tpu.vector_store %arg4[%c0_37, %c0_38, %c0_39], %95 {strides = array<i32>} : memref<1x1x256xf32, #tpu.memory_space<vmem>>, vector<1x1x256xf32>,
    } else {
    }
    %c1_i32_31 = arith.constant 1 : i32
    %85 = arith.cmpi slt, %81, %c1_i32_31 : i32
    %86 = arith.extui %85 : i1 to i32
    %c0_i32_32 = arith.constant 0 : i32
    %87 = arith.cmpi ne, %86, %c0_i32_32 : i32
    scf.if %87 {
      %88 = tpu.iota {dimensions = array<i32: 0>} : vector<1x256xi32>
      %c0_33 = arith.constant 0 : index
      %c0_34 = arith.constant 0 : index
      %c0_35 = arith.constant 0 : index
      %89 = vector.load %arg4[%c0_33, %c0_34, %c0_35] : memref<1x1x256xf32, #tpu.memory_space<vmem>>, vector<1x1x256xf32>
      %90 = vector.shape_cast %89 : vector<1x1x256xf32> to vector<1x256xf32>
      %91 = vector.broadcast %81 : i32 to vector<1x256xi32>
      %92 = arith.cmpi slt, %88, %91 : vector<1x256xi32>
      %cst_36 = arith.constant 0.000000e+00 : f32
      %93 = vector.broadcast %cst_36 : f32 to vector<1x256xf32>
      %94 = arith.select %92, %75, %93 : vector<1x256xi1>, vector<1x256xf32>
      %cst_37 = arith.constant dense<0.000000e+00> : vector<256xf32>
      %95 = vector.multi_reduction <add>, %94, %cst_37 [0] : vector<1x256xf32> to vector<256xf32>
      %96 = vector.shape_cast %95 : vector<256xf32> to vector<1x256xf32>
      %97 = arith.addf %90, %96 : vector<1x256xf32>
      %c0_38 = arith.constant 0 : index
      %c0_39 = arith.constant 0 : index
      %c0_40 = arith.constant 0 : index
      %98 = vector.load %arg4[%c0_38, %c0_39, %c0_40] : memref<1x1x256xf32, #tpu.memory_space<vmem>>, vector<1x1x256xf32>
      %99 = vector.shape_cast %98 : vector<1x1x256xf32> to vector<1x256xf32>
      %100 = vector.shape_cast %97 : vector<1x256xf32> to vector<1x1x256xf32>
      tpu.vector_store %arg4[%c0_38, %c0_39, %c0_40], %100 {strides = array<i32>} : memref<1x1x256xf32, #tpu.memory_space<vmem>>, vector<1x1x256xf32>,
    } else {
    }
    return
  }
  func.func @transform_0(%arg0: i32, %arg1: i32) -> (i32, i32, i32) {
    %c1_i32 = arith.constant 1 : i32
    %0 = arith.muli %arg0, %c1_i32 : i32
    %1 = arith.addi %0, %arg1 : i32
    %c1_i32_0 = arith.constant 1 : i32
    %2 = arith.minsi %1, %c1_i32_0 : i32
    %c0_i32 = arith.constant 0 : i32
    %c0_i32_1 = arith.constant 0 : i32
    %c0_i32_2 = arith.constant 0 : i32
    return %2, %c0_i32, %c0_i32_1 : i32, i32, i32
  }
  func.func @transform_1(%arg0: i32, %arg1: i32) -> (i32, i32) {
    %c0_i32 = arith.constant 0 : i32
    %c0_i32_0 = arith.constant 0 : i32
    %c0_i32_1 = arith.constant 0 : i32
    return %c0_i32, %c0_i32_0 : i32, i32
  }
  func.func @transform_2(%arg0: i32, %arg1: i32) -> (i32, i32, i32) {
    %c0_i32 = arith.constant 0 : i32
    %c0_i32_0 = arith.constant 0 : i32
    %c0_i32_1 = arith.constant 0 : i32
    return %arg0, %c0_i32, %c0_i32_0 : i32, i32, i32
  }
}

</mosaic_0001>

<bundles_post_ra>
// kernel: tpu_custom_call.1
= control target key start
LH: loop header
LB: loop body
LE: loop exit
PB: predicated region body
PF: predicated region fallthrough
CT: control target
= control target key end

     0   :  { %s1164_s0 = inlined_call_operand.hbm [shape: f32[2,4,256], index: 0, kind: input, shape index: {}]   ;;  %s1165_s1 = inlined_call_operand.hbm [shape: f32[2,256], index: 1, kind: input, shape index: {}]   ;;  %s1166_s2 = inlined_call_operand.hbm [shape: f32[2,1,256], index: 2, kind: output, shape index: {}]  }
   0x1   :  { %1168 = sst [smem:[#allocation12_spill]] %s1165_s1 }
   0x2   :  { %7 = vsyncpa [#allocation3], 0 }
   0x3   :  { %9 = vsyncpa [#allocation3 + $0x1], 0 }
   0x4   :  { %10 = vsyncpa [#allocation6], 0 }
   0x5   :  { %11 = vsyncpa [#allocation4], 0 }
   0x6   :  { %13 = vsyncpa [#allocation4 + $0x1], 0  ;;  %s860_s9 = smov 0   ;;  %s862_s10 = smov 0  }
   0x7   :  { %s864_s11 = smov 0   ;;  %s866_s12 = smov 0  }
   0x8   :  { %s868_s13 = smov 0   ;;  %s870_s14 = smov 0  }
   0x9   :  { %s872_s15 = smov 0   ;;  %s874_s16 = smov 0  }
   0xa   :  { %s876_s17 = smov 0  }
   0xb LB: > { %s536_s18 = sadd.s32 4294967295, %s837_s17   ;;  %s537_s19 = sadd.s32 4294967294, %s837_s17   ;;  %s837_s17 = sphi %s876_s17, %s19_s17   ;;  %s833_s16 = sphi %s874_s16, %s1191_s16   ;;  %s829_s15 = sphi %s872_s15, %s1190_s15   ;;  %s825_s14 = sphi %s870_s14, %s1189_s14   ;;  %s821_s13 = sphi %s868_s13, %s1188_s13   ;;  %s817_s12 = sphi %s866_s12, %s1187_s12   ;;  %s813_s11 = sphi %s864_s11, %s1186_s11   ;;  %s809_s10 = sphi %s862_s10, %s1185_s10   ;;  %s805_s9 = sphi %s860_s9, %s1184_s9  }
   0xc   : > { %p57_p0 = scmp.ne.s32.totalorder %s821_s13, %s817_s12  ;;  %p906_p1 = scmp.eq.s32.totalorder %s536_s18, 0 }
   0xd   : > { %p101_p2 = scmp.ne.s32.totalorder %s813_s11, %s809_s10  ;;  %p102_p4 = scmp.eq.s32.totalorder %s536_s18, 1 }
   0xe   : > { %p914_p3 = por %p906_p1, %p57_p0  ;;  %p107_p5 = scmp.ne.s32.totalorder %s809_s10, %s805_s9 }
   0xf   : > { %p108_p6 = scmp.eq.s32.totalorder %s537_s19, 1  ;;  %p920_p7 = por %p102_p4, %p101_p2 }
  0x10   : > { %p538_p8 = scmp.ge.s32.totalorder %s837_s17, 1  ;;  %p115_p10 = scmp.lt.s32.totalorder %s837_s17, 3 }
  0x11   : > { %p925_p9 = por %p108_p6, %p107_p5  ;;  %s1173_s1 = sld [smem:[#allocation12_spill]] }
  0x12   : > { %p933_p11 = pnand %p538_p8, %p115_p10  ;;  %p540_p12 = scmp.ge.s32.totalorder %s837_s17, 2 }
  0x13   : > { %s839_s28 = smov [#allocation5]   ;;  %s31_s30 = sadd.s32 1, %s833_s16 }
  0x14   : > { %p573_p13 = pneg %p933_p11  ;;  %s129_s29 = sshll.u32 %s839_s28, 4  ;;  %s130_s29 = int_to_ptr.vmem [resolvable:$true] %s129_s29 }
  0x15   : > { %p33_p2 = scmp.ge.s32.totalorder %s31_s30, 2  ;;  %p36_p4 = scmp.lt.s32.totalorder %s833_s16, 1 }
  0x16   : > { %p574_p0 = pnand %p573_p13, %p906_p1  ;;  %s91_s3 = sadd.s32 1, %s813_s11 }
  0x17   : > { %s127_s26 = sshll.u32 %s1173_s1, 4  ;;  %p51_p5 = scmp.ne.s32.totalorder %s825_s14, %s821_s13  ;;  %s128_s26 = int_to_ptr.hbm [resolvable:$true] %s127_s26 }
  0x18   : > { %576 = dma.hbm_to_vmem [thread:$0]  (!%p574_p0), %s128_s26, 64, %s130_s29, [#allocation6]  }
  0x19   : > { %s1193_s30 = smov (%p33_p2, %s31_s30), 0  ;;  %p52_p8 = scmp.eq.s32.totalorder %s837_s17, 0 }
  0x1a   : > { %1175 = sst [smem:[#allocation11_spill]] %s1193_s30  ;;  %p39_p6 = scmp.lt.s32.totalorder %s1193_s30, 1 }
  0x1b   : > { %s37_s4 = scalar_select %p36_p4, %s833_s16, 1 }
  0x1c   : > { %s44_s5 = sadd.s32 1, %s825_s14  ;;  %s88_s6 = ssub.s32 %s833_s16, %s1193_s30 }
  0x1d   : > { %s40_s7 = scalar_select %p39_p6, %s1193_s30, 1 }
  0x1e   : > { %p89_p10 = scmp.eq.s32.totalorder %s88_s6, 0  ;;  %p586_p13 = scmp.lt.s32.totalorder %s837_s17, 2 }
  0x1f   : > { %s41_s8 = ssub.s32 %s37_s4, %s40_s7  ;;  %p957_p0 = por %p52_p8, %p51_p5 }
  0x20   : > { %p42_p2 = scmp.eq.s32.totalorder %s41_s8, 0  ;;  %s140_s18 = sand.u32 1, %s825_s14  }
  0x21   : > { %s963_s19 = scalar_select %p89_p10, %s813_s11, %s91_s3  }
  0x22   : > { %s966_s24 = scalar_select %p42_p2, %s825_s14, %s44_s5  }
  0x23   : > { %s541_s25 = sshll.u32 %s140_s18, 3  ;;  %s562_s26 = sshll.u32 %s37_s4, 3 }
  0x24   : > { %s152_s6 = scalar_lea.hbm %s1164_s0, %s562_s26  ;;  %s144_s30 = scalar_lea.vmem [#allocation2], %s541_s25 }
  0x25   : > { %s154_s1 = sshll.u32 %s152_s6, 4  ;;  %s156_s7 = sshll.u32 %s144_s30, 4  ;;  %s155_s1 = int_to_ptr.hbm [resolvable:$true] %s154_s1  ;;  %s157_s7 = int_to_ptr.vmem [resolvable:$true] %s156_s7 }
  0x26   : > { %p578_p4 = pnand %p586_p13, %p957_p0  ;;  %s141_s8 = scalar_lea.sflag [#allocation3], %s140_s18 }
  0x27   : > { %165 = sbr.rel (%p933_p11) target bundleno = 256 (0x100), region = 28  ;;  %s167_s3 = sand.u32 (!%p933_p11), 1, %s821_s13  }
  0x28   : > { %580 = dma.hbm_to_vmem [thread:$0]  (!%p578_p4), %s155_s1, 128, %s157_s7, %s141_s8  }
  0x29   : > { %s545_s4 = sshll.u32 (!%p933_p11), %s167_s3, 3  ;;  %s168_s5 = scalar_lea.sflag (!%p933_p11), [#allocation3], %s167_s3 }
  0x2a   : > { %s171_s28 = scalar_lea.vmem (!%p933_p11), [#allocation2], %s545_s4 }
  0x2c   : > { %792 = dma.done.wait (%p914_p3), %s168_s5, 128  }
  0x2d   : > { %794 = vsyncadd (%p914_p3), %s168_s5, 4294967168 }
  0x2e   : > { %796 = dma.done.wait (%p906_p1), [#allocation6], 64  }
  0x2f   : > { %798 = vsyncadd (%p906_p1), [#allocation6], 4294967232  ;;  %s195_s1 = sand.u32 1, %s809_s10   ;;  %v205_v0 = vlaneseq  ;;  %v840_v3 = vmov 0.0   ;;  %s841_s20 = smov 112   ;;  %v210_v6 = vld [vmem:[%s171_s28] sm:$0xff] }
  0x30   : > { %s547_s27 = sshll.u32 %s195_s1, 1  ;;  %s842_s30 = smov 16   ;;  %v548_v7 = vrot.slane %v210_v6, 9  ;;  %v549_v8 = vrot.slane %v210_v6, 10  ;;  %v550_v11 = vrot.slane %v210_v6, 11  ;;  %vm262_vm9 = vcmask 1043456  }
  0x31   : > { %vm990_vm0 = vcmp.lt.s32.totalorder %v205_v0, 256  ;;  %v995_v2 = vand.u32 127, %v205_v0  ;;  %s997_s21 = scalar_lea.vmem [#allocation7], %s547_s27  ;;  %s843_s12 = smov 1  }
  0x32   : > { %209 = vst.msk [vmem:[%s997_s21] sm:$0x3] %vm990_vm0, %v840_v3  ;;  %v215_v10 = vadd.f32 %v548_v7, %v210_v6  ;;  %s844_s18 = smov 127   ;;  %s380_s25 = ssub.s32 2, %s829_s15 }
  0x33   : > { %v1004_v4 = vcvt.s32.f32 %v995_v2  ;;  %v227_v5 = vadd.s32 128, %v995_v2  ;;  %p381_p1 = scmp.gt.s32.totalorder %s380_s25, 0  ;;  %p551_p3 = scmp.lt.s32.totalorder %s380_s25, 1  ;;  %vm240_vm1 = vcmp.lt.s32.totalorder %v995_v2, 16  ;;  %vm270_vm2 = vcmp.lt.s32.totalorder %v995_v2, 112 }
  0x34   : > { %v219_v12 = vadd.f32 %v549_v8, %v215_v10  ;;  %vm302_vm3 = vcmp.lt.s32.totalorder %v995_v2, 1  ;;  %v1034_v30 = vld [vmem:[#allocation5] ss:$2 sm:$0x3]  ;;  %vm347_vm4 = vcmp.lt.s32.totalorder %v995_v2, 127 }
  0x35   : > { %273 = vrot.lane.b32.xlu1 %v1004_v4, %s841_s20  ;;  %243 = vrot.lane.b32.xlu0 %v1004_v4, %s842_s30  ;;  %v1010_v9 = vcvt.s32.f32 %v227_v5  ;;  %s382_s26 = scalar_select %p381_p1, %s380_s25, 0  ;;  %v1036_v31 = vld [vmem:[#allocation5 + $0x1] ss:$2 sm:$0x3]  ;;  %v317_v38 = vperm.slane %v1034_v30, 1  ;;  %v316_v46 = vperm.slane %v1034_v30, 0 }
  0x36   : > { %305 = vrot.lane.b32.xlu2 %v1004_v4, %s843_s12  ;;  %v223_v13 = vadd.f32 %v550_v11, %v219_v12  ;;  %v328_v39 = vperm.slane %v1036_v31, 1  ;;  %v327_v47 = vperm.slane %v1036_v31, 0 }
  0x37   : > { %s1195_s26 = smov (!%p551_p3, %s382_s26), 1 }
  0x38   : > { %v1015_v14 = vmul.f32 0.25, %v223_v13  ;;  %p556_p11 = scmp.ne.s32.totalorder %s1195_s26, 1 }
  0x3a   : > { %v233_v15 = vperm.slane %v1015_v14, 4  ;;  %v232_v16 = vperm.slane %v1015_v14, 0 }
  0x3d   : > { %275 = vrot.lane.b32.xlu1 %v1010_v9, %s841_s20  ;;  %245 = vrot.lane.b32.xlu0 %v1010_v9, %s842_s30 }
  0x3e   : > { %307 = vrot.lane.b32.xlu2 %v1010_v9, %s843_s12 }
  0x45   : > { %238 = vrot.lane.b32.xlu1 %v233_v15, %s842_s30  ;;  %236 = vrot.lane.b32.xlu0 %v232_v16, %s842_s30 }
  0x46   : > { %350 = vrot.lane.b32.xlu2 %v1004_v4, %s844_s18 }
  0x4d   : > { %266 = vrot.lane.b32.xlu1 %v232_v16, %s841_s20  ;;  %352 = vrot.lane.b32.xlu0 %v1010_v9, %s844_s18 }
  0x4e   : > { %268 = vrot.lane.b32.xlu2 %v233_v15, %s841_s20 }
  0x55   : > { %300 = vrot.lane.b32.xlu1 %v233_v15, %s843_s12  ;;  %298 = vrot.lane.b32.xlu0 %v232_v16, %s843_s12 }
  0x56   : > { %343 = vrot.lane.b32.xlu2 %v232_v16, %s844_s18 }
  0x5d   : > { %345 = vrot.lane.b32.xlu0 %v233_v15, %s844_s18 }
  0x90   : > { %v306_v17 = vpop.permute.xlu2 %305 }
  0x98   : > { %v308_v20 = vpop.permute.xlu2 %307 }
  0x99   : > { %v309_v28 = vsel %vm302_vm3, %v306_v17, %v308_v20  ;;  %v310_v40 = vsel %vm302_vm3, %v308_v20, %v306_v17 }
  0x9a   : > { %v312_v33 = vsub.f32 %v1010_v9, %v309_v28  ;;  %v323_v34 = vsub.f32 %v309_v28, %v1010_v9  ;;  %v311_v49 = vsub.f32 %v1004_v4, %v310_v40  ;;  %v322_v50 = vsub.f32 %v310_v40, %v1004_v4 }
  0x9c   : > { %vm314_vm5 = vcmp.eq.f32.partialorder %v312_v33, 1.0  ;;  %vm325_vm6 = vcmp.eq.f32.partialorder %v323_v34, 1.0  ;;  %vm1067_vm10 = vcmp.eq.f32.partialorder %v311_v49, 1.0  ;;  %vm1071_vm11 = vcmp.eq.f32.partialorder %v322_v50, 1.0 }
  0x9d   : > { %v321_v53 = vsel %vm314_vm5, %v317_v38, 0.0  ;;  %v332_v54 = vsel %vm325_vm6, %v328_v39, 0.0 }
  0x9e   : > { %v334_v7 = vadd.f32 %v332_v54, %v321_v53 }
  0xa0   : > { %v351_v24 = vpop.permute.xlu2 %350 }
  0xa7   : > { %v274_v18 = vpop.permute.xlu1 %273  ;;  %v244_v19 = vpop.permute.xlu0 %243 }
  0xa8   : > { %v269_v48 = vpop.permute.xlu2 %268 }
  0xaf   : > { %v276_v21 = vpop.permute.xlu1 %275  ;;  %v246_v22 = vpop.permute.xlu0 %245 }
  0xb0   : > { %v247_v23 = vsel %vm240_vm1, %v244_v19, %v246_v22  ;;  %v278_v27 = vsel %vm270_vm2, %v276_v21, %v274_v18  ;;  %v248_v35 = vsel %vm240_vm1, %v246_v22, %v244_v19  ;;  %v277_v36 = vsel %vm270_vm2, %v274_v18, %v276_v21  ;;  %v344_v31 = vpop.permute.xlu2 %343 }
  0xb1   : > { %v250_v29 = vsub.f32 %v1010_v9, %v247_v23  ;;  %v280_v32 = vsub.f32 %v1010_v9, %v278_v27  ;;  %v249_v42 = vsub.f32 %v1004_v4, %v248_v35  ;;  %v279_v45 = vsub.f32 %v1004_v4, %v277_v36 }
  0xb2   : > { %v320_v19 = vsel %vm1067_vm10, %v316_v46, 0.0 }
  0xb3   : > { %v252_v37 = vand.u32 2147483647, %v250_v29  ;;  %v282_v41 = vand.u32 2147483647, %v280_v32  ;;  %v251_v55 = vand.u32 2147483647, %v249_v42 }
  0xb4   : > { %v281_v56 = vand.u32 2147483647, %v279_v45 }
  0xb5   : > { %vm254_vm7 = vcmp.eq.f32.partialorder %v252_v37, 16.0  ;;  %vm284_vm8 = vcmp.eq.f32.partialorder %v282_v41, 16.0  ;;  %vm253_vm12 = vcmp.eq.f32.partialorder %v251_v55, 16.0 }
  0xb6   : > { %v256_v57 = vsel %vm254_vm7, 1.0, %v840_v3  ;;  %v286_v6 = vsel %vm284_vm8, 1.0, %v840_v3  ;;  %vm283_vm13 = vcmp.eq.f32.partialorder %v281_v56, 16.0  ;;  %v255_v20 = vsel %vm253_vm12, 1.0, %v840_v3 }
  0xb7   : > { %v239_v25 = vpop.permute.xlu1 %238  ;;  %v237_v26 = vpop.permute.xlu0 %236  ;;  %v285_v23 = vsel %vm283_vm13, 1.0, %v840_v3 }
  0xb8   : > { %v241_v51 = vsel %vm240_vm1, %v237_v26, %v239_v25  ;;  %v242_v15 = vsel %vm240_vm1, %v239_v25, %v237_v26 }
  0xb9   : > { %v258_v60 = vmul.f32 %v256_v57, %v241_v51  ;;  %v257_v21 = vmul.f32 %v255_v20, %v242_v15 }
  0xbb   : > { %v261_v17 = vrot.slane %v258_v60, 4 }
  0xbd   : > { %v263_v27 = vsel %vm262_vm9, %v257_v21, %v261_v17 }
  0xbf   : > { %v267_v43 = vpop.permute.xlu1 %266  ;;  %v353_v44 = vpop.permute.xlu0 %352 }
  0xc0   : > { %v355_v52 = vsel %vm347_vm4, %v353_v44, %v351_v24  ;;  %v272_v58 = vsel %vm270_vm2, %v269_v48, %v267_v43  ;;  %v354_v59 = vsel %vm347_vm4, %v351_v24, %v353_v44 }
  0xc1   : > { %v357_v61 = vsub.f32 %v1010_v9, %v355_v52  ;;  %v363_v62 = vsub.f32 %v355_v52, %v1010_v9  ;;  %v288_v8 = vmul.f32 %v286_v6, %v272_v58  ;;  %v356_v10 = vsub.f32 %v1004_v4, %v354_v59 }
  0xc2   : > { %v362_v11 = vsub.f32 %v354_v59, %v1004_v4  ;;  %v230_v9 = vmul.f32 -4.0, %v1015_v14  ;;  %v331_v4 = vsel %vm1071_vm11, %v327_v47, 0.0  ;;  %v271_v14 = vsel %vm270_vm2, %v267_v43, %v269_v48 }
  0xc3   : > { %vm359_vm14 = vcmp.eq.f32.partialorder %v357_v61, 1.0  ;;  %vm365_vm15 = vcmp.eq.f32.partialorder %v363_v62, 1.0  ;;  %v291_v22 = vrot.slane %v288_v8, 4  ;;  %vm358_vm1 = vcmp.eq.f32.partialorder %v356_v10, 1.0 }
  0xc4   : > { %vm364_vm5 = vcmp.eq.f32.partialorder %v362_v11, 1.0  ;;  %v361_v24 = vsel %vm359_vm14, %v317_v38, 0.0  ;;  %v367_v25 = vsel %vm365_vm15, %v328_v39, 0.0  ;;  %v287_v28 = vmul.f32 %v285_v23, %v271_v14 }
  0xc5   : > { %v333_v29 = vadd.f32 %v331_v4, %v320_v19  ;;  %v360_v32 = vsel %vm358_vm1, %v316_v46, 0.0  ;;  %v366_v33 = vsel %vm364_vm5, %v327_v47, 0.0  ;;  %v369_v36 = vadd.f32 %v367_v25, %v361_v24 }
  0xc6   : > { %v292_v34 = vsel %vm262_vm9, %v287_v28, %v291_v22  ;;  %v265_v40 = vadd.f32 %v263_v27, %v230_v9  ;;  %v368_v41 = vadd.f32 %v366_v33, %v360_v32 }
  0xc7   : > { %v301_v12 = vpop.permute.xlu1 %300  ;;  %v299_v13 = vpop.permute.xlu0 %298 }
  0xc8   : > { %v303_v16 = vsel %vm302_vm3, %v299_v13, %v301_v12  ;;  %v304_v26 = vsel %vm302_vm3, %v301_v12, %v299_v13  ;;  %v294_v43 = vadd.f32 %v292_v34, %v265_v40 }
  0xc9   : > { %v336_v18 = vmul.f32 %v334_v7, %v303_v16  ;;  %v335_v35 = vmul.f32 %v333_v29, %v304_v26 }
  0xcb   : > { %v339_v30 = vrot.slane %v336_v18, 4 }
  0xcd   : > { %v340_v39 = vsel %vm262_vm9, %v335_v35, %v339_v30 }
  0xce   : > { %v342_v46 = vadd.f32 %v340_v39, %v294_v43 }
  0xcf   : > { %v346_v37 = vpop.permute.xlu0 %345 }
  0xd0   : > { %v348_v3 = vsel %vm347_vm4, %v344_v31, %v346_v37  ;;  %v349_v38 = vsel %vm347_vm4, %v346_v37, %v344_v31 }
  0xd1   : > { %v371_v42 = vmul.f32 %v369_v36, %v349_v38  ;;  %v370_v44 = vmul.f32 %v368_v41, %v348_v3 }
  0xd3   : > { %v374_v45 = vrot.slane %v371_v42, 4 }
  0xd4   : > { %388 = sbr.rel (%p556_p11) target bundleno = 224 (0xe0), region = 44 }
  0xd5   : > { %v375_v47 = vsel %vm262_vm9, %v370_v44, %v374_v45 }
  0xd6   : > { %v377_v48 = vadd.f32 %v375_v47, %v342_v46 }
  0xd8   : > { %v378_v49 = vand.u32 2147483647, %v377_v48 }
  0xd9   : > { %v389_v50 = vld [vmem:[%s997_s21] sm:$0x3]  ;;  %vm393_vm2 = vcmask 1040384  }
  0xda   : > { %v392_v2 = vrot.slane %v378_v49, 3 }
  0xdc   : > { %v394_v51 = vsel %vm393_vm2, %v378_v49, %v392_v2 }
  0xdd   : > { %v396_v52 = vadd.f32 %v394_v51, %v389_v50 }
  0xdf   : > { %401 = vst.msk [vmem:[%s997_s21] sm:$0x3] %vm990_vm0, %v396_v52 }
  0xe0 PF: > { %p557_p5 = scmp.ge.s32.totalorder %s1195_s26, 1 }
  0xe2   : > { %405 = sbr.rel (%p557_p5) target bundleno = 241 (0xf1), region = 48 }
  0xe7   : > { %v407_v53 = vshrl.u32 %v205_v0, 7  ;;  %v409_v54 = vstv %s1195_s26  ;;  %v412_v55 = vperm.slane %v378_v49, 0  ;;  %v413_v56 = vperm.slane %v378_v49, 4  ;;  %v408_v59 = vld [vmem:[%s997_s21] sm:$0x3] }
  0xe8   : > { %vm423_vm4 = vcmask 1040384  }
  0xe9   : > { %vm410_vm3 = vcmp.lt.s32.totalorder %v407_v53, %v409_v54 }
  0xea   : > { %v416_v57 = vsel %vm410_vm3, %v412_v55, 0.0  ;;  %v417_v58 = vsel %vm410_vm3, %v413_v56, 0.0 }
  0xeb   : > { %v422_v60 = vrot.slane %v417_v58, 7 }
  0xed   : > { %v424_v61 = vsel %vm423_vm4, %v416_v57, %v422_v60 }
  0xee   : > { %v426_v62 = vadd.f32 %v424_v61, %v408_v59 }
  0xf0   : > { %431 = vst.msk [vmem:[%s997_s21] sm:$0x3] %vm990_vm0, %v426_v62 }
  0xf1 PF: > { %s559_s29 = sshll.u32 %s829_s15, 1  ;;  %s445_s3 = sshll.u32 %s997_s21, 4  ;;  %s446_s3 = int_to_ptr.vmem [resolvable:$true] %s445_s3 }
  0xf2   : > { %s443_s8 = scalar_lea.hbm %s1166_s2, %s559_s29  ;;  %s433_s5 = scalar_lea.sflag [#allocation4], %s195_s1 }
  0xf3   : > { %s447_s4 = sshll.u32 %s443_s8, 4  ;;  %s747_s15 = scalar_lea.hbm %s1166_s2, 4  ;;  %s448_s4 = int_to_ptr.hbm [resolvable:$true] %s447_s4 }
  0xf4   : > { %s741_s28 = sshra.s32 %s448_s4, 4  ;;  %s742_s28 = int_to_ptr.hbm [resolvable:$true] %s741_s28 }
  0xf5   : > { %s743_s27 = scalar_lea.hbm %s742_s28, 2  ;;  %p748_p13 = scmp.lt.s32.totalorder %s742_s28, %s1166_s2 }
  0xf6   : > { %p744_p6 = scmp.ne.s32.totalorder %s742_s28, %s743_s27  ;;  %p749_p0 = scmp.lt.s32.totalorder %s747_s15, %s743_s27 }
  0xf8   : > { %p745_p8 = pnand %p744_p6, %p920_p7  ;;  %p750_p2 = por %p749_p0, %p748_p13 }
  0xfa   : > { %p746_p10 = pneg %p745_p8 }
  0xfc   : > { %p751_p4 = pnand %p750_p2, %p746_p10 }
  0xfe   : > { %754 = shalt.err (!%p751_p4)
}
  0xff   : > { %571 = dma.vmem_to_hbm [thread:$0]  (%p920_p7), %s446_s3, 32, %s448_s4, %s433_s5  }
 0x100 PF: > { %s459_s1 = sand.u32 1, %s805_s9   ;;  %p582_p1 = pnand %p540_p12, %p925_p9 }
 0x101   : > { %s460_s21 = scalar_lea.sflag [#allocation4], %s459_s1 }
 0x102   : > { %p583_p3 = pneg %p582_p1 }
 0x104   : > { %800 = dma.done.wait (%p583_p3), %s460_s21, 32  }
 0x105   : > { %802 = vsyncadd (%p583_p3), %s460_s21, 4294967264  ;;  %s19_s17 = sadd.s32 1, %s837_s17   ;;  %s1183_s22 = sld [smem:[#allocation11_spill]] }
 0x106   : > { %p16_p11 = scmp.ge.s32.totalorder %s19_s17, 4   ;;  %s1184_s9 = smov %s809_s10 }
 0x107   : > { %s1185_s10 = smov %s813_s11  ;;  %s1186_s11 = smov %s963_s19 }
 0x108   : > { %s1187_s12 = smov %s821_s13  ;;  %s1188_s13 = smov %s825_s14 }
 0x109   : > { %s1189_s14 = smov %s966_s24  ;;  %s1190_s15 = smov %s833_s16 }
 0x10a   :  { %18 = sbr.rel (!%p16_p11) target bundleno = 11 (0xb), region = 90 }
 0x10b   : > { %s1191_s16 = smov %s1183_s22 }
 0x10f   :  { %466 = vsyncpa [#allocation3], 1 }
 0x110   :  { %468 = vsyncpa [#allocation3 + $0x1], 1 }
 0x111   :  { %469 = vsyncpa [#allocation6], 1 }
 0x112   :  { %470 = vsyncpa [#allocation4], 1 }
 0x113   :  { %472 = vsyncpa [#allocation4 + $0x1], 1 }

</bundles_post_ra>
